<compile_context>
chip_gen: v5e
topology: v5e:2x2
jax: 0.10.0
libtpu: 0.0.40
codegen_flags: <defaults>
</compile_context>

<pallas_src>
import math

import jax
import jax.numpy as jnp
from jax.experimental import pallas as pl
from jax.experimental.pallas import tpu as pltpu

HID_PAD = 128  # hidden width 64, zero-padded to one full 128-lane tile

# v7x has 2 TensorCores per chip; "parallel" has been measured as a near no-op
# for cross-core sharding, so multi-step grids use CORE_PARALLEL (fall back to
# "parallel" on older jax builds that lack the enum).
_MULTI_STEP_SEM = getattr(pltpu, "CORE_PARALLEL", "parallel")


def _cdiv(a, b):
    return -(-a // b)


def _round_up(n, m):
    return ((n + m - 1) // m) * m


def _choose_tb(batch, tb_cap):
    """Batch-tile size: cap rows per tile at tb_cap, keep >=4 tiles once the
    batch is large (>=2 grid steps per TensorCore on v7x for DMA/compute
    overlap), and avoid full-tile round-up waste on awkward batch sizes."""
    batch = max(int(batch), 1)
    n_tiles = _cdiv(batch, tb_cap)
    if batch >= 1024:
        n_tiles = max(n_tiles, 4)
    return _round_up(_cdiv(batch, n_tiles), 8)


def qnetwork_kernel(x_ref, w_ref, b_ref, o_ref):
    """Fused 3-layer MLP forward for one batch tile.

    x_ref: (tb, in_dim)   f32   raw observations (no lane padding in HBM)
    w_ref: (3, 128, 128)  bf16  packed zero-padded weights, [fan_in, fan_out]
    b_ref: (3, 128)       f32   packed zero-padded biases
    o_ref: (tb, out_dim)  f32   narrow Q-value block (contiguous rows in HBM)
    """
    in_dim = x_ref.shape[1]
    out_dim = o_ref.shape[1]
    b = b_ref[...]

    # Layer 1 on the VPU: in_dim is tiny (4-16 for DQN observations), so
    # x @ W1 is just `in_dim` broadcast multiply-adds over (tb, 128) f32 tiles.
    # Rows of w_ref[0] at index >= in_dim are zero, so this equals the padded
    # 128-wide matmul exactly, without ever building a padded copy of x.
    x = x_ref[...]                                     # (tb, in_dim) f32
    w0 = w_ref[0].astype(jnp.float32)                  # (128, 128)
    h1 = x[:, 0:1] * w0[0:1, :]
    for k in range(1, in_dim):                         # static unroll (trace time)
        h1 = h1 + x[:, k:k + 1] * w0[k:k + 1, :]
    h1 = jnp.maximum(h1 + b[0:1, :], 0.0)              # f32 epilogue (v5e-safe)

    # Layer 2: MXU matmul, bf16 inputs / f32 accumulate, f32 epilogue.
    h2 = jnp.dot(h1.astype(jnp.bfloat16), w_ref[1],
                 preferred_element_type=jnp.float32)
    h2 = jnp.maximum(h2 + b[1:2, :], 0.0)

    # Layer 3 (no activation); only the first out_dim lanes are real Q-values.
    q = jnp.dot(h2.astype(jnp.bfloat16), w_ref[2],
                preferred_element_type=jnp.float32) + b[2:3, :]
    o_ref[...] = q[:, :out_dim]


def pack_params(w1, b1, w2, b2, w3, b3):
    """Zero-pad and pack the three Linear layers into lane-dense slabs.

    Weights are stored [fan_in, fan_out] (transposed vs. PyTorch) so the kernel
    computes y = x @ W + b.  Zero padding keeps the math identical: padded
    weight rows/cols and bias lanes are 0 and ReLU(0) = 0, so padded lanes
    never leak into later layers.
    """
    assert w1.shape[0] <= HID_PAD and w3.shape[1] <= HID_PAD
    w_all = jnp.zeros((3, HID_PAD, HID_PAD), jnp.float32)
    w_all = w_all.at[0, : w1.shape[0], : w1.shape[1]].set(w1)
    w_all = w_all.at[1, : w2.shape[0], : w2.shape[1]].set(w2)
    w_all = w_all.at[2, : w3.shape[0], : w3.shape[1]].set(w3)

    b_all = jnp.zeros((3, HID_PAD), jnp.float32)
    b_all = b_all.at[0, : b1.shape[0]].set(b1)
    b_all = b_all.at[1, : b2.shape[0]].set(b2)
    b_all = b_all.at[2, : b3.shape[0]].set(b3)
    return w_all.astype(jnp.bfloat16), b_all


def qnetwork_forward(x, w_all, b_all, output_dim, *, tb_cap=1024):
    """x: [batch, input_dim] f32 -> Q-values [batch, output_dim] f32.

    tb_cap: per-tile row cap.  1024 is safe everywhere (a few MiB of VMEM); on
    v5e/v6e (128 MiB VMEM) it can be raised to 2048-4096 for very large
    batches -- the vmem_limit override below then kicks in automatically.
    """
    batch, in_dim = x.shape
    assert in_dim <= HID_PAD, "layer-1 VPU path assumes a small observation dim"
    # TODO(synk): for in_dim approaching 128, switch layer 1 back to an MXU dot
    # on a lane-padded x tile instead of the unrolled VPU MAC loop.

    tb = _choose_tb(batch, tb_cap)
    n_steps = _cdiv(batch, tb)
    b_pad = n_steps * tb
    if b_pad != batch:
        x = jnp.pad(x, ((0, b_pad - batch), (0, 0)))

    # Batch tiles are independent; multi-step grids are sharded across
    # TensorCores (matters on v7x), single-step grids just run.
    sem = _MULTI_STEP_SEM if n_steps > 1 else "arbitrary"

    # VMEM estimate: double-buffered x/out tiles (lane-padded to 128 in VMEM),
    # f32 h1/h2/q temporaries, resident weight/bias slabs.
    vmem_est = 4 * tb * 128 * 4 + 3 * tb * 128 * 4 + 2 * 3 * 128 * 128 * 2 + 8192
    vmem_limit = None
    if vmem_est > 12 * 1024 * 1024:            # only when a caller raises tb_cap
        vmem_limit = min(2 * vmem_est, 60 * 1024 * 1024)

    cost = pl.CostEstimate(
        flops=2 * b_pad * (in_dim * HID_PAD + 2 * HID_PAD * HID_PAD),
        transcendentals=0,
        bytes_accessed=(b_pad * (in_dim + output_dim) * 4
                        + int(w_all.size) * 2 + int(b_all.size) * 4),
    )

    out = pl.pallas_call(
        qnetwork_kernel,
        out_shape=jax.ShapeDtypeStruct((b_pad, output_dim), jnp.float32),
        grid_spec=pltpu.PrefetchScalarGridSpec(
            num_scalar_prefetch=0,
            grid=(n_steps,),
            in_specs=[
                # Raw observations: block width == full last array dim, so the
                # block is contiguous in HBM and only 4*in_dim bytes/row move.
                pl.BlockSpec((tb, in_dim), lambda i: (i, 0)),
                # Constant block index -> weights/biases stay VMEM-resident
                # across every batch-grid step (one ~96 KiB DMA total).
                pl.BlockSpec((3, HID_PAD, HID_PAD), lambda i: (0, 0, 0)),
                pl.BlockSpec((3, HID_PAD), lambda i: (0, 0)),
            ],
            # Narrow output block: only the real out_dim columns hit HBM.
            out_specs=pl.BlockSpec((tb, output_dim), lambda i: (i, 0)),
        ),
        compiler_params=pltpu.CompilerParams(
            dimension_semantics=(sem,),
            vmem_limit_bytes=vmem_limit,
        ),
        cost_estimate=cost,
    )(x, w_all, b_all)

    return out[:batch] if b_pad != batch else out


def init_qnetwork_params(key, input_dim, output_dim, hidden=64):
    """PyTorch nn.Linear default init: U(-1/sqrt(fan_in), 1/sqrt(fan_in))."""
    keys = jax.random.split(key, 6)
    dims = [(input_dim, hidden), (hidden, hidden), (hidden, output_dim)]
    params = []
    for i, (fan_in, fan_out) in enumerate(dims):
        bound = 1.0 / math.sqrt(fan_in)
        w = jax.random.uniform(keys[2 * i], (fan_in, fan_out), jnp.float32,
                               -bound, bound)
        b = jax.random.uniform(keys[2 * i + 1], (fan_out,), jnp.float32,
                               -bound, bound)
        params += [w, b]
    return tuple(params)


if __name__ == "__main__":
    # Small DQN-like shapes (CartPole-ish): 8 observations of dim 4, 2 actions.
    batch, input_dim, output_dim = 8, 4, 2

    root = jax.random.PRNGKey(0)
    k_x, k_p = jax.random.split(root)
    x = jax.random.normal(k_x, (batch, input_dim), jnp.float32)

    raw = init_qnetwork_params(k_p, input_dim, output_dim)
    w_all, b_all = pack_params(*raw)
    w1, b1, w2, b2, w3, b3 = raw

    # --- single-tile path ---
    q_values = qnetwork_forward(x, w_all, b_all, output_dim)
    jax.block_until_ready(q_values)
    assert q_values.shape == (batch, output_dim)

    # Reference A: same arithmetic as the kernel (f32 layer 1 with bf16-rounded
    # weights, bf16 inputs / f32 accumulation for layers 2-3) -> tight match.
    h = jnp.maximum(x @ w_all[0, :input_dim, :].astype(jnp.float32) + b_all[0], 0.0)
    h = jnp.maximum(jnp.dot(h.astype(jnp.bfloat16), w_all[1],
                            preferred_element_type=jnp.float32) + b_all[1], 0.0)
    ref_k = (jnp.dot(h.astype(jnp.bfloat16), w_all[2],
                     preferred_element_type=jnp.float32)
             + b_all[2])[:, :output_dim]
    assert jnp.allclose(q_values, ref_k, atol=2e-3, rtol=2e-3)

    # Reference B: exact f32 PyTorch-module semantics (loose tolerance for the
    # bf16 weight/intermediate rounding the kernel uses).
    ref = jnp.maximum(x @ w1 + b1, 0.0)
    ref = jnp.maximum(ref @ w2 + b2, 0.0)
    ref = ref @ w3 + b3
    assert jnp.allclose(q_values, ref, atol=3e-2, rtol=3e-2)

    # --- multi-tile path: several grid steps (CORE_PARALLEL on v7x) plus a
    # padded final tile (batch=200, tb_cap=64 -> tb=56, 4 steps, 224 rows). ---
    batch2 = 200
    x2 = jax.random.normal(jax.random.PRNGKey(1), (batch2, input_dim), jnp.float32)
    q2 = qnetwork_forward(x2, w_all, b_all, output_dim, tb_cap=64)
    jax.block_until_ready(q2)
    assert q2.shape == (batch2, output_dim)
    ref2 = jnp.maximum(x2 @ w1 + b1, 0.0)
    ref2 = jnp.maximum(ref2 @ w2 + b2, 0.0)
    ref2 = ref2 @ w3 + b3
    assert jnp.allclose(q2, ref2, atol=3e-2, rtol=3e-2)

    print("KERNEL_OK")
</pallas_src>

<mosaic_0001>
module attributes {stable_mosaic.version = 11 : i64} {
  func.func @qnetwork_kernel(%arg0: i32, %arg1: memref<8x4xf32, #tpu.memory_space<vmem>>, %arg2: memref<3x128x128xbf16, #tpu.memory_space<vmem>>, %arg3: memref<3x128xf32, #tpu.memory_space<vmem>>, %arg4: memref<8x2xf32, #tpu.memory_space<vmem>>) attributes {dimension_semantics = [#tpu.dimension_semantics<arbitrary>], iteration_bounds = array<i64: 1>, scalar_prefetch = 0 : i64, scratch_operands = 0 : i64, tpu.core_type = #tpu.core_type<tc>, window_params = [{transform_indices = @transform_0, window_bounds = array<i64: 8, 4>}, {pipeline_mode = #tpu.pipeline_mode<synchronous>, transform_indices = @transform_1, window_bounds = array<i64: 3, 128, 128>}, {pipeline_mode = #tpu.pipeline_mode<synchronous>, transform_indices = @transform_2, window_bounds = array<i64: 3, 128>}, {transform_indices = @transform_3, window_bounds = array<i64: 8, 2>}]} {
    %c0 = arith.constant 0 : index
    %c0_0 = arith.constant 0 : index
    %0 = vector.load %arg3[%c0, %c0_0] : memref<3x128xf32, #tpu.memory_space<vmem>>, vector<3x128xf32>
    %c0_1 = arith.constant 0 : index
    %c0_2 = arith.constant 0 : index
    %1 = vector.load %arg1[%c0_1, %c0_2] : memref<8x4xf32, #tpu.memory_space<vmem>>, vector<8x4xf32>
    %c0_3 = arith.constant 0 : index
    %c0_4 = arith.constant 0 : index
    %c0_5 = arith.constant 0 : index
    %2 = vector.load %arg2[%c0_3, %c0_4, %c0_5] : memref<3x128x128xbf16, #tpu.memory_space<vmem>>, vector<1x128x128xbf16>
    %3 = vector.shape_cast %2 : vector<1x128x128xbf16> to vector<128x128xbf16>
    %4 = arith.extf %3 : vector<128x128xbf16> to vector<128x128xf32>
    %5 = vector.extract_strided_slice %1 {offsets = [0, 0], sizes = [8, 1], strides = [1, 1]} : vector<8x4xf32> to vector<8x1xf32>
    %6 = vector.extract_strided_slice %4 {offsets = [0, 0], sizes = [1, 128], strides = [1, 1]} : vector<128x128xf32> to vector<1x128xf32>
    %7 = vector.broadcast %5 : vector<8x1xf32> to vector<8x128xf32>
    %8 = vector.broadcast %6 : vector<1x128xf32> to vector<8x128xf32>
    %9 = arith.mulf %7, %8 : vector<8x128xf32>
    %10 = vector.extract_strided_slice %1 {offsets = [0, 1], sizes = [8, 1], strides = [1, 1]} : vector<8x4xf32> to vector<8x1xf32>
    %11 = vector.extract_strided_slice %4 {offsets = [1, 0], sizes = [1, 128], strides = [1, 1]} : vector<128x128xf32> to vector<1x128xf32>
    %12 = vector.broadcast %10 : vector<8x1xf32> to vector<8x128xf32>
    %13 = vector.broadcast %11 : vector<1x128xf32> to vector<8x128xf32>
    %14 = arith.mulf %12, %13 : vector<8x128xf32>
    %15 = arith.addf %9, %14 : vector<8x128xf32>
    %16 = vector.extract_strided_slice %1 {offsets = [0, 2], sizes = [8, 1], strides = [1, 1]} : vector<8x4xf32> to vector<8x1xf32>
    %17 = vector.extract_strided_slice %4 {offsets = [2, 0], sizes = [1, 128], strides = [1, 1]} : vector<128x128xf32> to vector<1x128xf32>
    %18 = vector.broadcast %16 : vector<8x1xf32> to vector<8x128xf32>
    %19 = vector.broadcast %17 : vector<1x128xf32> to vector<8x128xf32>
    %20 = arith.mulf %18, %19 : vector<8x128xf32>
    %21 = arith.addf %15, %20 : vector<8x128xf32>
    %22 = vector.extract_strided_slice %1 {offsets = [0, 3], sizes = [8, 1], strides = [1, 1]} : vector<8x4xf32> to vector<8x1xf32>
    %23 = vector.extract_strided_slice %4 {offsets = [3, 0], sizes = [1, 128], strides = [1, 1]} : vector<128x128xf32> to vector<1x128xf32>
    %24 = vector.broadcast %22 : vector<8x1xf32> to vector<8x128xf32>
    %25 = vector.broadcast %23 : vector<1x128xf32> to vector<8x128xf32>
    %26 = arith.mulf %24, %25 : vector<8x128xf32>
    %27 = arith.addf %21, %26 : vector<8x128xf32>
    %28 = vector.extract_strided_slice %0 {offsets = [0, 0], sizes = [1, 128], strides = [1, 1]} : vector<3x128xf32> to vector<1x128xf32>
    %29 = vector.broadcast %28 : vector<1x128xf32> to vector<8x128xf32>
    %30 = arith.addf %27, %29 : vector<8x128xf32>
    %cst = arith.constant 0.000000e+00 : f32
    %31 = vector.broadcast %cst : f32 to vector<8x128xf32>
    %32 = arith.maximumf %30, %31 : vector<8x128xf32>
    %33 = arith.truncf %32 : vector<8x128xf32> to vector<8x128xbf16>
    %c1 = arith.constant 1 : index
    %c0_6 = arith.constant 0 : index
    %c0_7 = arith.constant 0 : index
    %34 = vector.load %arg2[%c1, %c0_6, %c0_7] : memref<3x128x128xbf16, #tpu.memory_space<vmem>>, vector<1x128x128xbf16>
    %35 = vector.shape_cast %34 : vector<1x128x128xbf16> to vector<128x128xbf16>
    %cst_8 = arith.constant dense<0.000000e+00> : vector<8x128xf32>
    %36 = tpu.matmul %33, %35, %cst_8 {dimension_numbers = #tpu.dot_dimension_numbers<[1], [0], [0], [1], [0, 0, 1, 1], [], []>} : vector<8x128xbf16>, vector<128x128xbf16>, vector<8x128xf32> -> vector<8x128xf32>
    %37 = vector.extract_strided_slice %0 {offsets = [1, 0], sizes = [1, 128], strides = [1, 1]} : vector<3x128xf32> to vector<1x128xf32>
    %38 = vector.broadcast %37 : vector<1x128xf32> to vector<8x128xf32>
    %39 = arith.addf %36, %38 : vector<8x128xf32>
    %cst_9 = arith.constant 0.000000e+00 : f32
    %40 = vector.broadcast %cst_9 : f32 to vector<8x128xf32>
    %41 = arith.maximumf %39, %40 : vector<8x128xf32>
    %42 = arith.truncf %41 : vector<8x128xf32> to vector<8x128xbf16>
    %c2 = arith.constant 2 : index
    %c0_10 = arith.constant 0 : index
    %c0_11 = arith.constant 0 : index
    %43 = vector.load %arg2[%c2, %c0_10, %c0_11] : memref<3x128x128xbf16, #tpu.memory_space<vmem>>, vector<1x128x128xbf16>
    %44 = vector.shape_cast %43 : vector<1x128x128xbf16> to vector<128x128xbf16>
    %cst_12 = arith.constant dense<0.000000e+00> : vector<8x128xf32>
    %45 = tpu.matmul %42, %44, %cst_12 {dimension_numbers = #tpu.dot_dimension_numbers<[1], [0], [0], [1], [0, 0, 1, 1], [], []>} : vector<8x128xbf16>, vector<128x128xbf16>, vector<8x128xf32> -> vector<8x128xf32>
    %46 = vector.extract_strided_slice %0 {offsets = [2, 0], sizes = [1, 128], strides = [1, 1]} : vector<3x128xf32> to vector<1x128xf32>
    %47 = vector.broadcast %46 : vector<1x128xf32> to vector<8x128xf32>
    %48 = arith.addf %45, %47 : vector<8x128xf32>
    %49 = vector.extract_strided_slice %48 {offsets = [0, 0], sizes = [8, 2], strides = [1, 1]} : vector<8x128xf32> to vector<8x2xf32>
    %c0_13 = arith.constant 0 : index
    %c0_14 = arith.constant 0 : index
    %50 = vector.load %arg4[%c0_13, %c0_14] : memref<8x2xf32, #tpu.memory_space<vmem>>, vector<8x2xf32>
    tpu.vector_store %arg4[%c0_13, %c0_14], %49 {strides = array<i32>} : memref<8x2xf32, #tpu.memory_space<vmem>>, vector<8x2xf32>,
    return
  }
  func.func @transform_0(%arg0: i32) -> (i32, i32) {
    %c0_i32 = arith.constant 0 : i32
    %c0_i32_0 = arith.constant 0 : i32
    return %arg0, %c0_i32 : i32, i32
  }
  func.func @transform_1(%arg0: i32) -> (i32, i32, i32) {
    %c0_i32 = arith.constant 0 : i32
    %c0_i32_0 = arith.constant 0 : i32
    %c0_i32_1 = arith.constant 0 : i32
    %c0_i32_2 = arith.constant 0 : i32
    return %c0_i32, %c0_i32_0, %c0_i32_1 : i32, i32, i32
  }
  func.func @transform_2(%arg0: i32) -> (i32, i32) {
    %c0_i32 = arith.constant 0 : i32
    %c0_i32_0 = arith.constant 0 : i32
    %c0_i32_1 = arith.constant 0 : i32
    return %c0_i32, %c0_i32_0 : i32, i32
  }
  func.func @transform_3(%arg0: i32) -> (i32, i32) {
    %c0_i32 = arith.constant 0 : i32
    %c0_i32_0 = arith.constant 0 : i32
    return %arg0, %c0_i32 : i32, i32
  }
}

</mosaic_0001>

<bundles_post_ra>
// kernel: tpu_custom_call.1
= control target key start
LH: loop header
LB: loop body
LE: loop exit
PB: predicated region body
PF: predicated region fallthrough
CT: control target
= control target key end

     0   :  { %8 = vsyncpa [#allocation3], 0  ;;  %s351_s15 = smov [#allocation2]   ;;  %s352_s17 = smov 64   ;;  %s390_s0 = inlined_call_operand.vmem [shape: f32[8,4], index: 0, kind: input, shape index: {}]   ;;  %s391_s1 = inlined_call_operand.hbm [shape: bf16[3,128,128], index: 1, kind: input, shape index: {}]   ;;  %s392_s2 = inlined_call_operand.vmem [shape: f32[3,128], index: 2, kind: input, shape index: {}]   ;;  %s393_s3 = inlined_call_operand.vmem [shape: f32[8,2], index: 3, kind: output, shape index: {}]  }
   0x1   :  { %s15_s14 = sshll.u32 %s391_s1, 4  ;;  %s17_s16 = sshll.u32 %s351_s15, 4  ;;  %s16_s14 = int_to_ptr.hbm [resolvable:$true] %s15_s14  ;;  %s18_s16 = int_to_ptr.vmem [resolvable:$true] %s17_s16 }
   0x2   :  { %s353_s18 = smov 4  }
   0x3   :  { %23 = dma.hbm_to_vmem [thread:$0]  %s16_s14, 3072, %s18_s16, [#allocation3], %s352_s17, %s352_s17, %s353_s18  }
   0x4   :  { %349 = dma.done.wait [#allocation3], 3072  }
   0x5   :  { %350 = vsyncadd [#allocation3], 4294964224  ;;  %v354_v0 = vmov 0   ;;  %v355_v1 = vmov 2   ;;  %v31_v2 = vld [vmem:[%s390_s0] sm:$0xff]  ;;  %v304_v3 = vld [vmem:[#allocation2 + $0x78] sm:$0xff] }
   0x6   :  { %320 = vset.pattern.permute.xlu0 %v354_v0  ;;  %322 = vset.pattern.permute.xlu1 %v355_v1  ;;  %v303_v4 = vld [vmem:[#allocation2 + $0x70] sm:$0xff]  ;;  %v356_v5 = vmov 1   ;;  %v357_v6 = vmov 3   ;;  %v302_v7 = vld [vmem:[#allocation2 + $0x68] sm:$0xff]  ;;  %v301_v8 = vld [vmem:[#allocation2 + $0x60] sm:$0xff]  ;;  %vm226_vm0 = vcmask 15360  }
   0x7   :  { %36 = vperm.xlu0 %320, %v31_v2   ;;  %49 = vperm.xlu1 %322, %v31_v2   ;;  %v300_v9 = vld [vmem:[#allocation2 + $0x58] sm:$0xff]  ;;  %v299_v10 = vld [vmem:[#allocation2 + $0x50] sm:$0xff]  ;;  %v298_v11 = vld [vmem:[#allocation2 + $0x48] sm:$0xff] }
   0x8   :  { %132 = vmatpush.bf16.msra.mxu0 %v304_v3  ;;  %v297_v12 = vld [vmem:[#allocation2 + $0x40] sm:$0xff]  ;;  %v312_v13 = vld [vmem:[#allocation2 + $0xb8] sm:$0xff]  ;;  %v311_v14 = vld [vmem:[#allocation2 + $0xb0] sm:$0xff] }
   0x9   :  { %213 = vmatpush.bf16.msra.mxu1 %v312_v13  ;;  %v310_v15 = vld [vmem:[#allocation2 + $0xa8] sm:$0xff]  ;;  %v32_v16 = vld [vmem:[#allocation2] sm:$0xf]  ;;  %v308_v23 = vld [vmem:[#allocation2 + $0x98] sm:$0xff] }
   0xa   :  { %v33_v19 = vunpack.c.l.bf16 %v32_v16  ;;  %v309_v20 = vld [vmem:[#allocation2 + $0xa0] sm:$0xff]  ;;  %v307_v30 = vld [vmem:[#allocation2 + $0x90] sm:$0xff]  ;;  %v306_v41 = vld [vmem:[#allocation2 + $0x88] sm:$0xff] }
   0xb   :  { %v30_v31 = vld [vmem:[%s392_s2] sm:$0x7] }
   0xc   :  { %133 = vmatpush.bf16.msra.mxu0 %v303_v4  ;;  %v39_v21 = vperm.slane %v33_v19, 0  ;;  %v45_v22 = vperm.slane %v33_v19, 1  ;;  %v52_v24 = vperm.slane %v33_v19, 2  ;;  %v59_v25 = vperm.slane %v33_v19, 3  ;;  %v305_v42 = vld [vmem:[#allocation2 + $0x80] sm:$0xff] }
   0xd   :  { %214 = vmatpush.bf16.msra.mxu1 %v311_v14  ;;  %v62_v36 = vperm.slane %v30_v31, 0  ;;  %v83_v43 = vperm.slane %v30_v31, 1  ;;  %v164_v49 = vperm.slane %v30_v31, 2 }
   0xf   :  { %321 = vset.pattern.permute.xlu0 %v356_v5  ;;  %323 = vset.pattern.permute.xlu1 %v357_v6 }
  0x10   :  { %42 = vperm.xlu0 %321, %v31_v2   ;;  %56 = vperm.xlu1 %323, %v31_v2  }
  0x11   :  { %134 = vmatpush.bf16.msra.mxu0 %v302_v7  ;;  %215 = vmatpush.bf16.msra.mxu1 %v310_v15 }
  0x15   :  { %135 = vmatpush.bf16.msra.mxu0 %v301_v8  ;;  %216 = vmatpush.bf16.msra.mxu1 %v309_v20 }
  0x18   :  { %324 = vset.pattern.permute.xlu0 %v357_v6 }
  0x19   :  { %136 = vmatpush.bf16.msra.mxu0 %v300_v9  ;;  %217 = vmatpush.bf16.msra.mxu1 %v308_v23 }
  0x1d   :  { %137 = vmatpush.bf16.msra.mxu0 %v299_v10  ;;  %218 = vmatpush.bf16.msra.mxu1 %v307_v30 }
  0x21   :  { %138 = vmatpush.bf16.msra.mxu0 %v298_v11  ;;  %219 = vmatpush.bf16.msra.mxu1 %v306_v41 }
  0x25   :  { %139 = vmatpush.bf16.msra.mxu0 %v297_v12  ;;  %220 = vmatpush.bf16.msra.mxu1 %v305_v42 }
  0x79   :  { %v37_v17 = vpop.permute.xlu0 %36  ;;  %v50_v18 = vpop.permute.xlu1 %49 }
  0x7a   :  { %v40_v28 = vmul.f32 %v39_v21, %v37_v17  ;;  %v53_v32 = vmul.f32 %v52_v24, %v50_v18 }
  0x82   :  { %v43_v26 = vpop.permute.xlu0 %42  ;;  %v57_v27 = vpop.permute.xlu1 %56 }
  0x83   :  { %v46_v29 = vmul.f32 %v45_v22, %v43_v26  ;;  %v60_v34 = vmul.f32 %v59_v25, %v57_v27 }
  0x85   :  { %v47_v33 = vadd.f32 %v46_v29, %v40_v28 }
  0x87   :  { %v54_v35 = vadd.f32 %v53_v32, %v47_v33 }
  0x89   :  { %v61_v37 = vadd.f32 %v60_v34, %v54_v35 }
  0x8b   :  { %v63_v38 = vadd.f32 %v62_v36, %v61_v37 }
  0x8d   :  { %v64_v39 = vmax.f32 %v63_v38, 0.0 }
  0x8f   :  { %v65_v40 = vpack.c.bf16 %v64_v39, %v64_v39 }
  0x91   :  { %140 = vmatmul.bf16.vlgmr.msra.gmra.mxu0 %v65_v40 }
 0x10e   :  { %v141_v44 = vpop.f32.mrf.mxu0 }
 0x10f   :  { %v142_v45 = vadd.f32 %v141_v44, %v83_v43 }
 0x111   :  { %v145_v46 = vmax.f32 %v142_v45, 0.0 }
 0x113   :  { %v146_v47 = vpack.c.bf16 %v145_v46, %v145_v46 }
 0x115   :  { %221 = vmatmul.bf16.vlgmr.msra.gmra.mxu1 %v146_v47 }
 0x116   :  { %v143_v48 = vpop.f32.mrf.mxu0 }
 0x192   :  { %v222_v50 = vpop.f32.mrf.mxu1 }
 0x193   :  { %v223_v51 = vadd.f32 %v222_v50, %v164_v49 }
 0x195   :  { %227 = vst.msk [vmem:[%s393_s3] sm:$0xff] %vm226_vm0, %v223_v51 }
 0x19a   :  { %v224_v52 = vpop.f32.mrf.mxu1 }
 0x19b   :  { %232 = vsyncpa [#allocation3], 1 }

</bundles_post_ra>
